<compile_context>
chip_gen: v7x
topology: tpu7x:2x2x1
jax: 0.10.0
libtpu: 0.0.40
codegen_flags: <defaults>
</compile_context>

<pallas_src>
import functools

import jax
import jax.numpy as jnp
from jax import lax
from jax.experimental import pallas as pl
from jax.experimental.pallas import tpu as pltpu


def _fused_enhance_kernel(x_ref, wt1_ref, b1_ref, wt2_ref, b2_ref, o_ref, *, H, W):
    """Fused Conv3x3 -> ReLU -> Conv3x3 (+bias, +residual) on a block of B images.

    x_ref  : (B, Cin, S)     S = H*W, spatial flattened into the lane axis
    wt1_ref: (Chid, 9*Cin)   column (ky*3+kx)*Cin  + ci == w1[ky, kx, ci, :]
    b1_ref : (Chid, 1)
    wt2_ref: (Cin, 9*Chid)   column (ky*3+kx)*Chid + ci == w2[ky, kx, ci, :]
    b2_ref : (Cin, 1)
    o_ref  : (B, Cin, S)
    """
    f32 = jnp.float32
    B, Cin, S = x_ref.shape

    # Hoisted loads: input, weights and biases are read & cast exactly once per block.
    x = x_ref[...].astype(f32)
    w1 = wt1_ref[...].astype(f32)
    w2 = wt2_ref[...].astype(f32)
    b1 = b1_ref[...].astype(f32)
    b2 = b2_ref[...].astype(f32)

    # Halo masks, built once per block and shared by both convs.  Spatial shifts are
    # per-row lane rotations (wrap-around), so both row and column bounds are masked.
    # The masks are periodic per image and rolls act per (image, channel) row, so no
    # cross-image or cross-channel leakage is possible.
    pos = lax.broadcasted_iota(jnp.int32, (1, 1, S), 2)
    if W & (W - 1) == 0:                 # power-of-two fast path (W = 16)
        col = pos & (W - 1)
    else:                                # TODO(synk): vector modulo; prefer pow2 W
        col = pos % W
    col_l = col >= 1                     # source col-1 in range   (dx = -1)
    col_r = col <= W - 2                 # source col+1 in range   (dx = +1)
    row_t = pos >= W                     # source row-1 in range   (dy = -1)
    row_b = pos < (H - 1) * W            # source row+1 in range   (dy = +1)
    tap_mask = {
        (-1, -1): row_t & col_l, (-1, 0): row_t, (-1, 1): row_t & col_r,
        (0, -1): col_l,          (0, 0): None,   (0, 1): col_r,
        (1, -1): row_b & col_l,  (1, 0): row_b,  (1, 1): row_b & col_r,
    }

    def conv3x3(a, w):
        """'same' 3x3 conv of a:(B, cin, S) with w:(cout, 9*cin) via im2col + MXU."""
        cin = a.shape[1]
        a2 = a.reshape(B * cin, S)       # free: each row is one (image, channel) plane
        planes = []
        for ky in range(3):
            for kx in range(3):
                dy, dx = ky - 1, kx - 1
                off = dy * W + dx
                if off:                  # XLU lane rotation (free slot vs the VALU)
                    p = pltpu.roll(a2, shift=(-off) % S, axis=1).reshape(B, cin, S)
                else:
                    p = a
                m = tap_mask[(dy, dx)]
                if m is not None:
                    p = jnp.where(m, p, 0.0)
                planes.append(p)
        pcat = jnp.concatenate(planes, axis=1)            # (B, 9*cin, S) im2col
        # One small MXU matmul per image in the block (K = 9*cin, N = S): the whole
        # multiply-accumulate runs on the vmatmul slot instead of the VALU.
        outs = [jnp.dot(w, pcat[b], preferred_element_type=f32) for b in range(B)]
        return jnp.stack(outs, axis=0)                    # (B, cout, S)

    # conv1 + bias + ReLU: hidden activation lives entirely in VMEM/vregs.
    h = jnp.maximum(conv3x3(x, w1) + b1[None], 0.0)       # (B, Chid, S)
    # conv2 + bias + residual (the residual reuses the already-loaded x block).
    y = conv3x3(h, w2) + b2[None] + x                     # (B, Cin, S)
    o_ref[...] = y.astype(o_ref.dtype)                    # lane-dense store


def fused_enhancement_pallas(x_flat, wt1, b1, wt2, b2, *, H, W):
    """Single fused pallas_call for the whole forward; grid over batch blocks."""
    N, Cin, S = x_flat.shape
    Chid = wt1.shape[0]
    assert S == H * W
    # Block B images per grid step (biggest lever at small N/H/W: amortises the
    # ~600-cycle per-step overhead and the per-block mask/weight setup).  Keep >=2
    # grid steps when the batch allows it so the 'parallel' axis can still feed both
    # v7x TensorCores; on v5e/v6e the grid is just a serial loop either way.
    num_blocks = 2 if (N >= 4 and N % 2 == 0) else 1
    B = N // num_blocks
    kernel = functools.partial(_fused_enhance_kernel, H=H, W=W)
    return pl.pallas_call(
        kernel,
        out_shape=jax.ShapeDtypeStruct((N, Cin, S), x_flat.dtype),
        grid=(num_blocks,),
        in_specs=[
            pl.BlockSpec((B, Cin, S), lambda i: (i, 0, 0)),      # x, lane-dense
            pl.BlockSpec((Chid, 9 * Cin), lambda i: (0, 0)),     # w1 (resident)
            pl.BlockSpec((Chid, 1), lambda i: (0, 0)),           # b1
            pl.BlockSpec((Cin, 9 * Chid), lambda i: (0, 0)),     # w2 (resident)
            pl.BlockSpec((Cin, 1), lambda i: (0, 0)),            # b2
        ],
        out_specs=pl.BlockSpec((B, Cin, S), lambda i: (i, 0, 0)),
        compiler_params=pltpu.CompilerParams(
            dimension_semantics=("parallel",)),
    )(x_flat, wt1, b1, wt2, b2)


def init_params(key, cin=4, chid=8):
    """Deterministic parameter init (HWIO conv weights, matching nn.Conv2d shapes)."""
    k1, k2, k3, k4 = jax.random.split(key, 4)
    w1 = jax.random.normal(k1, (3, 3, cin, chid), jnp.float32) * (2.0 / (9 * cin)) ** 0.5
    b1 = jax.random.normal(k2, (chid,), jnp.float32) * 0.01
    w2 = jax.random.normal(k3, (3, 3, chid, cin), jnp.float32) * (2.0 / (9 * chid)) ** 0.5
    b2 = jax.random.normal(k4, (cin,), jnp.float32) * 0.01
    return {"w1": w1, "b1": b1, "w2": w2, "b2": b2}


@jax.jit
def enhancement_cnn_forward(x_nchw, params):
    """Forward pass. Input/output follow the PyTorch NCHW convention."""
    N, C, H, W = x_nchw.shape
    chid = params["w1"].shape[-1]
    # Free layout moves only (contiguous reshapes + tiny weight re-packs):
    # no activation transpose, no host-side pad, no HBM round trip for h.
    x_flat = x_nchw.reshape(N, C, H * W)
    wt1 = params["w1"].reshape(9 * C, chid).T      # (Chid, 9*Cin)
    wt2 = params["w2"].reshape(9 * chid, C).T      # (Cin, 9*Chid)
    b1 = params["b1"].reshape(chid, 1)
    b2 = params["b2"].reshape(C, 1)
    y_flat = fused_enhancement_pallas(x_flat, wt1, b1, wt2, b2, H=H, W=W)
    return y_flat.reshape(N, C, H, W)


def _reference_forward(x_nchw, params):
    """Pure-JAX reference (lax conv, full f32 precision) for correctness checking."""
    x = jnp.transpose(x_nchw, (0, 2, 3, 1))
    dn = ("NHWC", "HWIO", "NHWC")
    prec = lax.Precision.HIGHEST
    h = lax.conv_general_dilated(x, params["w1"], (1, 1), "SAME",
                                 dimension_numbers=dn, precision=prec) + params["b1"]
    h = jnp.maximum(h, 0.0)
    y = lax.conv_general_dilated(h, params["w2"], (1, 1), "SAME",
                                 dimension_numbers=dn, precision=prec) + params["b2"]
    y = y + x
    return jnp.transpose(y, (0, 3, 1, 2))


if __name__ == "__main__":
    key = jax.random.PRNGKey(0)
    kx, kp = jax.random.split(key)

    N, C, H, W = 2, 4, 16, 16
    x = jax.random.normal(kx, (N, C, H, W), jnp.float32)   # NCHW, like torch input
    params = init_params(kp, cin=C, chid=8)

    out = enhancement_cnn_forward(x, params)
    out = jax.block_until_ready(out)

    ref = _reference_forward(x, params)
    assert out.shape == (N, C, H, W)
    assert jnp.allclose(out, ref, atol=1e-3, rtol=1e-3), "Pallas kernel mismatch vs reference"

    print("KERNEL_OK")
</pallas_src>

<mosaic_0001>
module attributes {stable_mosaic.version = 11 : i64} {
  func.func @_fused_enhance_kernel(%arg0: i32, %arg1: memref<2x4x256xf32, #tpu.memory_space<vmem>>, %arg2: memref<8x36xf32, #tpu.memory_space<vmem>>, %arg3: memref<8x1xf32, #tpu.memory_space<vmem>>, %arg4: memref<4x72xf32, #tpu.memory_space<vmem>>, %arg5: memref<4x1xf32, #tpu.memory_space<vmem>>, %arg6: memref<2x4x256xf32, #tpu.memory_space<vmem>>) attributes {dimension_semantics = [#tpu.dimension_semantics<parallel>], iteration_bounds = array<i64: 1>, scalar_prefetch = 0 : i64, scratch_operands = 0 : i64, tpu.core_type = #tpu.core_type<tc>, window_params = [{transform_indices = @transform_0, window_bounds = array<i64: 2, 4, 256>}, {pipeline_mode = #tpu.pipeline_mode<synchronous>, transform_indices = @transform_1, window_bounds = array<i64: 8, 36>}, {pipeline_mode = #tpu.pipeline_mode<synchronous>, transform_indices = @transform_2, window_bounds = array<i64: 8, 1>}, {pipeline_mode = #tpu.pipeline_mode<synchronous>, transform_indices = @transform_3, window_bounds = array<i64: 4, 72>}, {pipeline_mode = #tpu.pipeline_mode<synchronous>, transform_indices = @transform_4, window_bounds = array<i64: 4, 1>}, {transform_indices = @transform_5, window_bounds = array<i64: 2, 4, 256>}]} {
    %c0 = arith.constant 0 : index
    %c0_0 = arith.constant 0 : index
    %c0_1 = arith.constant 0 : index
    %0 = vector.load %arg1[%c0, %c0_0, %c0_1] : memref<2x4x256xf32, #tpu.memory_space<vmem>>, vector<2x4x256xf32>
    %c0_2 = arith.constant 0 : index
    %c0_3 = arith.constant 0 : index
    %1 = vector.load %arg2[%c0_2, %c0_3] : memref<8x36xf32, #tpu.memory_space<vmem>>, vector<8x36xf32>
    %c0_4 = arith.constant 0 : index
    %c0_5 = arith.constant 0 : index
    %2 = vector.load %arg4[%c0_4, %c0_5] : memref<4x72xf32, #tpu.memory_space<vmem>>, vector<4x72xf32>
    %c0_6 = arith.constant 0 : index
    %c0_7 = arith.constant 0 : index
    %3 = vector.load %arg3[%c0_6, %c0_7] : memref<8x1xf32, #tpu.memory_space<vmem>>, vector<8x1xf32>
    %c0_8 = arith.constant 0 : index
    %c0_9 = arith.constant 0 : index
    %4 = vector.load %arg5[%c0_8, %c0_9] : memref<4x1xf32, #tpu.memory_space<vmem>>, vector<4x1xf32>
    %5 = tpu.iota {dimensions = array<i32: 2>} : vector<1x1x256xi32>
    %c15_i32 = arith.constant 15 : i32
    %6 = vector.broadcast %c15_i32 : i32 to vector<1x1x256xi32>
    %7 = arith.andi %5, %6 : vector<1x1x256xi32>
    %c1_i32 = arith.constant 1 : i32
    %8 = vector.broadcast %c1_i32 : i32 to vector<1x1x256xi32>
    %9 = arith.cmpi sge, %7, %8 : vector<1x1x256xi32>
    %c14_i32 = arith.constant 14 : i32
    %10 = vector.broadcast %c14_i32 : i32 to vector<1x1x256xi32>
    %11 = arith.cmpi sle, %7, %10 : vector<1x1x256xi32>
    %c16_i32 = arith.constant 16 : i32
    %12 = vector.broadcast %c16_i32 : i32 to vector<1x1x256xi32>
    %13 = arith.cmpi sge, %5, %12 : vector<1x1x256xi32>
    %c240_i32 = arith.constant 240 : i32
    %14 = vector.broadcast %c240_i32 : i32 to vector<1x1x256xi32>
    %15 = arith.cmpi slt, %5, %14 : vector<1x1x256xi32>
    %16 = arith.andi %13, %9 : vector<1x1x256xi1>
    %17 = arith.andi %13, %11 : vector<1x1x256xi1>
    %18 = arith.andi %15, %9 : vector<1x1x256xi1>
    %19 = arith.andi %15, %11 : vector<1x1x256xi1>
    %20 = vector.shape_cast %0 : vector<2x4x256xf32> to vector<8x256xf32>
    %c17_i32 = arith.constant 17 : i32
    %21 = tpu.dynamic_rotate %20 by %c17_i32 dim 1 : vector<8x256xf32>, i32 -> vector<8x256xf32>
    %22 = vector.shape_cast %21 : vector<8x256xf32> to vector<2x4x256xf32>
    %cst = arith.constant 0.000000e+00 : f32
    %23 = vector.shape_cast %16 : vector<1x1x256xi1> to vector<1x1x256xi1>
    %24 = vector.broadcast %23 : vector<1x1x256xi1> to vector<2x4x256xi1>
    %25 = vector.broadcast %cst : f32 to vector<2x4x256xf32>
    %26 = arith.select %24, %22, %25 : vector<2x4x256xi1>, vector<2x4x256xf32>
    %c16_i32_10 = arith.constant 16 : i32
    %27 = tpu.dynamic_rotate %20 by %c16_i32_10 dim 1 : vector<8x256xf32>, i32 -> vector<8x256xf32>
    %28 = vector.shape_cast %27 : vector<8x256xf32> to vector<2x4x256xf32>
    %cst_11 = arith.constant 0.000000e+00 : f32
    %29 = vector.shape_cast %13 : vector<1x1x256xi1> to vector<1x1x256xi1>
    %30 = vector.broadcast %29 : vector<1x1x256xi1> to vector<2x4x256xi1>
    %31 = vector.broadcast %cst_11 : f32 to vector<2x4x256xf32>
    %32 = arith.select %30, %28, %31 : vector<2x4x256xi1>, vector<2x4x256xf32>
    %c15_i32_12 = arith.constant 15 : i32
    %33 = tpu.dynamic_rotate %20 by %c15_i32_12 dim 1 : vector<8x256xf32>, i32 -> vector<8x256xf32>
    %34 = vector.shape_cast %33 : vector<8x256xf32> to vector<2x4x256xf32>
    %cst_13 = arith.constant 0.000000e+00 : f32
    %35 = vector.shape_cast %17 : vector<1x1x256xi1> to vector<1x1x256xi1>
    %36 = vector.broadcast %35 : vector<1x1x256xi1> to vector<2x4x256xi1>
    %37 = vector.broadcast %cst_13 : f32 to vector<2x4x256xf32>
    %38 = arith.select %36, %34, %37 : vector<2x4x256xi1>, vector<2x4x256xf32>
    %c1_i32_14 = arith.constant 1 : i32
    %39 = tpu.dynamic_rotate %20 by %c1_i32_14 dim 1 : vector<8x256xf32>, i32 -> vector<8x256xf32>
    %40 = vector.shape_cast %39 : vector<8x256xf32> to vector<2x4x256xf32>
    %cst_15 = arith.constant 0.000000e+00 : f32
    %41 = vector.shape_cast %9 : vector<1x1x256xi1> to vector<1x1x256xi1>
    %42 = vector.broadcast %41 : vector<1x1x256xi1> to vector<2x4x256xi1>
    %43 = vector.broadcast %cst_15 : f32 to vector<2x4x256xf32>
    %44 = arith.select %42, %40, %43 : vector<2x4x256xi1>, vector<2x4x256xf32>
    %c255_i32 = arith.constant 255 : i32
    %45 = tpu.dynamic_rotate %20 by %c255_i32 dim 1 : vector<8x256xf32>, i32 -> vector<8x256xf32>
    %46 = vector.shape_cast %45 : vector<8x256xf32> to vector<2x4x256xf32>
    %cst_16 = arith.constant 0.000000e+00 : f32
    %47 = vector.shape_cast %11 : vector<1x1x256xi1> to vector<1x1x256xi1>
    %48 = vector.broadcast %47 : vector<1x1x256xi1> to vector<2x4x256xi1>
    %49 = vector.broadcast %cst_16 : f32 to vector<2x4x256xf32>
    %50 = arith.select %48, %46, %49 : vector<2x4x256xi1>, vector<2x4x256xf32>
    %c241_i32 = arith.constant 241 : i32
    %51 = tpu.dynamic_rotate %20 by %c241_i32 dim 1 : vector<8x256xf32>, i32 -> vector<8x256xf32>
    %52 = vector.shape_cast %51 : vector<8x256xf32> to vector<2x4x256xf32>
    %cst_17 = arith.constant 0.000000e+00 : f32
    %53 = vector.shape_cast %18 : vector<1x1x256xi1> to vector<1x1x256xi1>
    %54 = vector.broadcast %53 : vector<1x1x256xi1> to vector<2x4x256xi1>
    %55 = vector.broadcast %cst_17 : f32 to vector<2x4x256xf32>
    %56 = arith.select %54, %52, %55 : vector<2x4x256xi1>, vector<2x4x256xf32>
    %c240_i32_18 = arith.constant 240 : i32
    %57 = tpu.dynamic_rotate %20 by %c240_i32_18 dim 1 : vector<8x256xf32>, i32 -> vector<8x256xf32>
    %58 = vector.shape_cast %57 : vector<8x256xf32> to vector<2x4x256xf32>
    %cst_19 = arith.constant 0.000000e+00 : f32
    %59 = vector.shape_cast %15 : vector<1x1x256xi1> to vector<1x1x256xi1>
    %60 = vector.broadcast %59 : vector<1x1x256xi1> to vector<2x4x256xi1>
    %61 = vector.broadcast %cst_19 : f32 to vector<2x4x256xf32>
    %62 = arith.select %60, %58, %61 : vector<2x4x256xi1>, vector<2x4x256xf32>
    %c239_i32 = arith.constant 239 : i32
    %63 = tpu.dynamic_rotate %20 by %c239_i32 dim 1 : vector<8x256xf32>, i32 -> vector<8x256xf32>
    %64 = vector.shape_cast %63 : vector<8x256xf32> to vector<2x4x256xf32>
    %cst_20 = arith.constant 0.000000e+00 : f32
    %65 = vector.shape_cast %19 : vector<1x1x256xi1> to vector<1x1x256xi1>
    %66 = vector.broadcast %65 : vector<1x1x256xi1> to vector<2x4x256xi1>
    %67 = vector.broadcast %cst_20 : f32 to vector<2x4x256xf32>
    %68 = arith.select %66, %64, %67 : vector<2x4x256xi1>, vector<2x4x256xf32>
    %69 = tpu.concatenate %26, %32, %38, %44, %0, %50, %56, %62, %68 in 1 : vector<2x4x256xf32>, vector<2x4x256xf32>, vector<2x4x256xf32>, vector<2x4x256xf32>, vector<2x4x256xf32>, vector<2x4x256xf32>, vector<2x4x256xf32>, vector<2x4x256xf32>, vector<2x4x256xf32> -> vector<2x36x256xf32>
    %70 = vector.extract_strided_slice %69 {offsets = [0, 0, 0], sizes = [1, 36, 256], strides = [1, 1, 1]} : vector<2x36x256xf32> to vector<1x36x256xf32>
    %71 = vector.shape_cast %70 : vector<1x36x256xf32> to vector<36x256xf32>
    %cst_21 = arith.constant dense<0.000000e+00> : vector<8x256xf32>
    %72 = tpu.matmul %1, %71, %cst_21 {dimension_numbers = #tpu.dot_dimension_numbers<[1], [0], [0], [1], [0, 0, 1, 1], [], []>} : vector<8x36xf32>, vector<36x256xf32>, vector<8x256xf32> -> vector<8x256xf32>
    %73 = vector.extract_strided_slice %69 {offsets = [1, 0, 0], sizes = [1, 36, 256], strides = [1, 1, 1]} : vector<2x36x256xf32> to vector<1x36x256xf32>
    %74 = vector.shape_cast %73 : vector<1x36x256xf32> to vector<36x256xf32>
    %cst_22 = arith.constant dense<0.000000e+00> : vector<8x256xf32>
    %75 = tpu.matmul %1, %74, %cst_22 {dimension_numbers = #tpu.dot_dimension_numbers<[1], [0], [0], [1], [0, 0, 1, 1], [], []>} : vector<8x36xf32>, vector<36x256xf32>, vector<8x256xf32> -> vector<8x256xf32>
    %76 = vector.shape_cast %72 : vector<8x256xf32> to vector<1x8x256xf32>
    %77 = vector.shape_cast %75 : vector<8x256xf32> to vector<1x8x256xf32>
    %78 = tpu.concatenate %76, %77 in 0 : vector<1x8x256xf32>, vector<1x8x256xf32> -> vector<2x8x256xf32>
    %79 = vector.shape_cast %3 : vector<8x1xf32> to vector<1x8x1xf32>
    %80 = vector.broadcast %79 : vector<1x8x1xf32> to vector<2x8x256xf32>
    %81 = arith.addf %78, %80 : vector<2x8x256xf32>
    %cst_23 = arith.constant 0.000000e+00 : f32
    %82 = vector.broadcast %cst_23 : f32 to vector<2x8x256xf32>
    %83 = arith.maximumf %81, %82 : vector<2x8x256xf32>
    %84 = vector.shape_cast %83 : vector<2x8x256xf32> to vector<16x256xf32>
    %c17_i32_24 = arith.constant 17 : i32
    %85 = tpu.dynamic_rotate %84 by %c17_i32_24 dim 1 : vector<16x256xf32>, i32 -> vector<16x256xf32>
    %86 = vector.shape_cast %85 : vector<16x256xf32> to vector<2x8x256xf32>
    %cst_25 = arith.constant 0.000000e+00 : f32
    %87 = vector.shape_cast %16 : vector<1x1x256xi1> to vector<1x1x256xi1>
    %88 = vector.broadcast %87 : vector<1x1x256xi1> to vector<2x8x256xi1>
    %89 = vector.broadcast %cst_25 : f32 to vector<2x8x256xf32>
    %90 = arith.select %88, %86, %89 : vector<2x8x256xi1>, vector<2x8x256xf32>
    %c16_i32_26 = arith.constant 16 : i32
    %91 = tpu.dynamic_rotate %84 by %c16_i32_26 dim 1 : vector<16x256xf32>, i32 -> vector<16x256xf32>
    %92 = vector.shape_cast %91 : vector<16x256xf32> to vector<2x8x256xf32>
    %cst_27 = arith.constant 0.000000e+00 : f32
    %93 = vector.shape_cast %13 : vector<1x1x256xi1> to vector<1x1x256xi1>
    %94 = vector.broadcast %93 : vector<1x1x256xi1> to vector<2x8x256xi1>
    %95 = vector.broadcast %cst_27 : f32 to vector<2x8x256xf32>
    %96 = arith.select %94, %92, %95 : vector<2x8x256xi1>, vector<2x8x256xf32>
    %c15_i32_28 = arith.constant 15 : i32
    %97 = tpu.dynamic_rotate %84 by %c15_i32_28 dim 1 : vector<16x256xf32>, i32 -> vector<16x256xf32>
    %98 = vector.shape_cast %97 : vector<16x256xf32> to vector<2x8x256xf32>
    %cst_29 = arith.constant 0.000000e+00 : f32
    %99 = vector.shape_cast %17 : vector<1x1x256xi1> to vector<1x1x256xi1>
    %100 = vector.broadcast %99 : vector<1x1x256xi1> to vector<2x8x256xi1>
    %101 = vector.broadcast %cst_29 : f32 to vector<2x8x256xf32>
    %102 = arith.select %100, %98, %101 : vector<2x8x256xi1>, vector<2x8x256xf32>
    %c1_i32_30 = arith.constant 1 : i32
    %103 = tpu.dynamic_rotate %84 by %c1_i32_30 dim 1 : vector<16x256xf32>, i32 -> vector<16x256xf32>
    %104 = vector.shape_cast %103 : vector<16x256xf32> to vector<2x8x256xf32>
    %cst_31 = arith.constant 0.000000e+00 : f32
    %105 = vector.shape_cast %9 : vector<1x1x256xi1> to vector<1x1x256xi1>
    %106 = vector.broadcast %105 : vector<1x1x256xi1> to vector<2x8x256xi1>
    %107 = vector.broadcast %cst_31 : f32 to vector<2x8x256xf32>
    %108 = arith.select %106, %104, %107 : vector<2x8x256xi1>, vector<2x8x256xf32>
    %c255_i32_32 = arith.constant 255 : i32
    %109 = tpu.dynamic_rotate %84 by %c255_i32_32 dim 1 : vector<16x256xf32>, i32 -> vector<16x256xf32>
    %110 = vector.shape_cast %109 : vector<16x256xf32> to vector<2x8x256xf32>
    %cst_33 = arith.constant 0.000000e+00 : f32
    %111 = vector.shape_cast %11 : vector<1x1x256xi1> to vector<1x1x256xi1>
    %112 = vector.broadcast %111 : vector<1x1x256xi1> to vector<2x8x256xi1>
    %113 = vector.broadcast %cst_33 : f32 to vector<2x8x256xf32>
    %114 = arith.select %112, %110, %113 : vector<2x8x256xi1>, vector<2x8x256xf32>
    %c241_i32_34 = arith.constant 241 : i32
    %115 = tpu.dynamic_rotate %84 by %c241_i32_34 dim 1 : vector<16x256xf32>, i32 -> vector<16x256xf32>
    %116 = vector.shape_cast %115 : vector<16x256xf32> to vector<2x8x256xf32>
    %cst_35 = arith.constant 0.000000e+00 : f32
    %117 = vector.shape_cast %18 : vector<1x1x256xi1> to vector<1x1x256xi1>
    %118 = vector.broadcast %117 : vector<1x1x256xi1> to vector<2x8x256xi1>
    %119 = vector.broadcast %cst_35 : f32 to vector<2x8x256xf32>
    %120 = arith.select %118, %116, %119 : vector<2x8x256xi1>, vector<2x8x256xf32>
    %c240_i32_36 = arith.constant 240 : i32
    %121 = tpu.dynamic_rotate %84 by %c240_i32_36 dim 1 : vector<16x256xf32>, i32 -> vector<16x256xf32>
    %122 = vector.shape_cast %121 : vector<16x256xf32> to vector<2x8x256xf32>
    %cst_37 = arith.constant 0.000000e+00 : f32
    %123 = vector.shape_cast %15 : vector<1x1x256xi1> to vector<1x1x256xi1>
    %124 = vector.broadcast %123 : vector<1x1x256xi1> to vector<2x8x256xi1>
    %125 = vector.broadcast %cst_37 : f32 to vector<2x8x256xf32>
    %126 = arith.select %124, %122, %125 : vector<2x8x256xi1>, vector<2x8x256xf32>
    %c239_i32_38 = arith.constant 239 : i32
    %127 = tpu.dynamic_rotate %84 by %c239_i32_38 dim 1 : vector<16x256xf32>, i32 -> vector<16x256xf32>
    %128 = vector.shape_cast %127 : vector<16x256xf32> to vector<2x8x256xf32>
    %cst_39 = arith.constant 0.000000e+00 : f32
    %129 = vector.shape_cast %19 : vector<1x1x256xi1> to vector<1x1x256xi1>
    %130 = vector.broadcast %129 : vector<1x1x256xi1> to vector<2x8x256xi1>
    %131 = vector.broadcast %cst_39 : f32 to vector<2x8x256xf32>
    %132 = arith.select %130, %128, %131 : vector<2x8x256xi1>, vector<2x8x256xf32>
    %133 = tpu.concatenate %90, %96, %102, %108, %83, %114, %120, %126, %132 in 1 : vector<2x8x256xf32>, vector<2x8x256xf32>, vector<2x8x256xf32>, vector<2x8x256xf32>, vector<2x8x256xf32>, vector<2x8x256xf32>, vector<2x8x256xf32>, vector<2x8x256xf32>, vector<2x8x256xf32> -> vector<2x72x256xf32>
    %134 = vector.extract_strided_slice %133 {offsets = [0, 0, 0], sizes = [1, 72, 256], strides = [1, 1, 1]} : vector<2x72x256xf32> to vector<1x72x256xf32>
    %135 = vector.shape_cast %134 : vector<1x72x256xf32> to vector<72x256xf32>
    %cst_40 = arith.constant dense<0.000000e+00> : vector<4x256xf32>
    %136 = tpu.matmul %2, %135, %cst_40 {dimension_numbers = #tpu.dot_dimension_numbers<[1], [0], [0], [1], [0, 0, 1, 1], [], []>} : vector<4x72xf32>, vector<72x256xf32>, vector<4x256xf32> -> vector<4x256xf32>
    %137 = vector.extract_strided_slice %133 {offsets = [1, 0, 0], sizes = [1, 72, 256], strides = [1, 1, 1]} : vector<2x72x256xf32> to vector<1x72x256xf32>
    %138 = vector.shape_cast %137 : vector<1x72x256xf32> to vector<72x256xf32>
    %cst_41 = arith.constant dense<0.000000e+00> : vector<4x256xf32>
    %139 = tpu.matmul %2, %138, %cst_41 {dimension_numbers = #tpu.dot_dimension_numbers<[1], [0], [0], [1], [0, 0, 1, 1], [], []>} : vector<4x72xf32>, vector<72x256xf32>, vector<4x256xf32> -> vector<4x256xf32>
    %140 = vector.shape_cast %136 : vector<4x256xf32> to vector<1x4x256xf32>
    %141 = vector.shape_cast %139 : vector<4x256xf32> to vector<1x4x256xf32>
    %142 = tpu.concatenate %140, %141 in 0 : vector<1x4x256xf32>, vector<1x4x256xf32> -> vector<2x4x256xf32>
    %143 = vector.shape_cast %4 : vector<4x1xf32> to vector<1x4x1xf32>
    %144 = vector.broadcast %143 : vector<1x4x1xf32> to vector<2x4x256xf32>
    %145 = arith.addf %142, %144 : vector<2x4x256xf32>
    %146 = arith.addf %145, %0 : vector<2x4x256xf32>
    %c0_42 = arith.constant 0 : index
    %c0_43 = arith.constant 0 : index
    %c0_44 = arith.constant 0 : index
    %147 = vector.load %arg6[%c0_42, %c0_43, %c0_44] : memref<2x4x256xf32, #tpu.memory_space<vmem>>, vector<2x4x256xf32>
    tpu.vector_store %arg6[%c0_42, %c0_43, %c0_44], %146 {strides = array<i32>} : memref<2x4x256xf32, #tpu.memory_space<vmem>>, vector<2x4x256xf32>,
    return
  }
  func.func @transform_0(%arg0: i32) -> (i32, i32, i32) {
    %c0_i32 = arith.constant 0 : i32
    %c0_i32_0 = arith.constant 0 : i32
    %c0_i32_1 = arith.constant 0 : i32
    return %arg0, %c0_i32, %c0_i32_0 : i32, i32, i32
  }
  func.func @transform_1(%arg0: i32) -> (i32, i32) {
    %c0_i32 = arith.constant 0 : i32
    %c0_i32_0 = arith.constant 0 : i32
    %c0_i32_1 = arith.constant 0 : i32
    return %c0_i32, %c0_i32_0 : i32, i32
  }
  func.func @transform_2(%arg0: i32) -> (i32, i32) {
    %c0_i32 = arith.constant 0 : i32
    %c0_i32_0 = arith.constant 0 : i32
    %c0_i32_1 = arith.constant 0 : i32
    return %c0_i32, %c0_i32_0 : i32, i32
  }
  func.func @transform_3(%arg0: i32) -> (i32, i32) {
    %c0_i32 = arith.constant 0 : i32
    %c0_i32_0 = arith.constant 0 : i32
    %c0_i32_1 = arith.constant 0 : i32
    return %c0_i32, %c0_i32_0 : i32, i32
  }
  func.func @transform_4(%arg0: i32) -> (i32, i32) {
    %c0_i32 = arith.constant 0 : i32
    %c0_i32_0 = arith.constant 0 : i32
    %c0_i32_1 = arith.constant 0 : i32
    return %c0_i32, %c0_i32_0 : i32, i32
  }
  func.func @transform_5(%arg0: i32) -> (i32, i32, i32) {
    %c0_i32 = arith.constant 0 : i32
    %c0_i32_0 = arith.constant 0 : i32
    %c0_i32_1 = arith.constant 0 : i32
    return %arg0, %c0_i32, %c0_i32_0 : i32, i32, i32
  }
}

</mosaic_0001>

<bundles_post_ra>
// kernel: enhancement_cnn_forward.1
= control target key start
LH: loop header
LB: loop body
LE: loop exit
PB: predicated region body
PF: predicated region fallthrough
CT: control target
= control target key end

     0   :  { %s996_s22 = smov 16   ;;  %s997_s23 = smov 1   ;;  %v1003_v4 = vmov 0.0   ;;  %v1005_v5 = vmov 0   ;;  %v26_v7 = vlaneseq  ;;  %vm305_vm7 = vcmask 1043456   ;;  %s1442_s0 = inlined_call_operand.vmem [shape: f32[2,4,256], index: 0, kind: input, shape index: {}]   ;;  %s1443_s2 = inlined_call_operand.vmem [shape: f32[8,1], index: 2, kind: input, shape index: {}]   ;;  %s1444_s1 = inlined_call_operand.vmem [shape: f32[8,36], index: 1, kind: input, shape index: {}]   ;;  %s1445_s4 = inlined_call_operand.vmem [shape: f32[4,1], index: 4, kind: input, shape index: {}]   ;;  %s1446_s3 = inlined_call_operand.vmem [shape: f32[4,72], index: 3, kind: input, shape index: {}]   ;;  %s1447_s5 = inlined_call_operand.vmem [shape: f32[2,4,256], index: 5, kind: output, shape index: {}]  }
   0x1   :  { %v1040_v0 = vld [vmem:[%s1442_s0] sm:$0xff]  ;;  %v1045_v1 = vld [vmem:[%s1442_s0 + $0x8] sm:$0xff]  ;;  %s998_s24 = smov 17   ;;  %s999_s0 = smov 15   ;;  %396 = vmatprep.mubr.f32.mxu0 %v1003_v4  ;;  %473 = vmatprep.mubr.f32.mxu1 %v1003_v4 }
   0x2   :  { %v49_v2 = vcombine.low %v1040_v0, %v1045_v1  ;;  %v50_v3 = vcombine.high %v1040_v0, %v1045_v1  ;;  %s1000_s25 = smov 127   ;;  %s1001_s26 = smov 112   ;;  %921 = vset.pattern.permute.xlu0 %v1005_v5  ;;  %v24_v6 = vld [vmem:[%s1443_s2] sm:$0xff]  ;;  %v1072_v8 = vand.u32 127, %v26_v7  ;;  %v1121_v34 = vcombine.high %v1040_v0, %v1040_v0 }
   0x3   :  { %s1002_s27 = smov 113   ;;  %s1004_s28 = smov 111   ;;  %v1133_v38 = vcombine.high %v1045_v1, %v1045_v1  ;;  %v23_v15 = vld [vmem:[%s1446_s3] sm:$0xf] }
   0x4   :  { %78 = vrot.lane.b32.xlu1 %v49_v2, %s996_s22  ;;  %128 = vrot.lane.b32.xlu0 %v49_v2, %s997_s23  ;;  %v1075_v9 = vadd.s32 128, %v1072_v8  ;;  %v29_v12 = vand.u32 15, %v1072_v8  ;;  %vm82_vm0 = vcmp.lt.s32.totalorder %v1072_v8, 16  ;;  %vm132_vm1 = vcmp.lt.s32.totalorder %v1072_v8, 1 }
   0x5   :  { %vm35_vm2 = vcmp.ge.s32.totalorder %v1072_v8, 16  ;;  %vm57_vm3 = vcmp.lt.s32.totalorder %v1072_v8, 17  ;;  %vm107_vm5 = vcmp.lt.s32.totalorder %v1072_v8, 15  ;;  %vm1448_vm9 = vcmp.lt.s32.totalorder %v1072_v8, 127 }
   0x6   :  { %v30_v13 = vand.u32 15, %v1075_v9  ;;  %vm1083_vm4 = vcmp.ge.s32.totalorder %v29_v12, 1  ;;  %vm1088_vm6 = vcmp.le.s32.totalorder %v29_v12, 14  ;;  %vm1449_vm12 = vcmp.lt.s32.totalorder %v1072_v8, 112 }
   0x7   :  { %vm1145_vm11 = vmand %vm35_vm2, %vm1083_vm4  ;;  %vm1451_vm14 = vcmp.lt.s32.totalorder %v1075_v9, 240  ;;  %vm182_vm15 = vcmp.lt.s32.totalorder %v1072_v8, 113 }
   0x8   :  { %80 = vrot.lane.b32.xlu1 %v50_v3, %s996_s22  ;;  %130 = vrot.lane.b32.xlu0 %v50_v3, %s997_s23  ;;  %vm1104_vm8 = vcmp.le.s32.totalorder %v30_v13, 14  ;;  %vm1109_vm10 = vcmp.ge.s32.totalorder %v30_v13, 1  ;;  %vm1166_vm13 = vmand %vm35_vm2, %vm1088_vm6 }
   0xc   :  { %55 = vrot.lane.b32.xlu1 %v50_v3, %s998_s24  ;;  %53 = vrot.lane.b32.xlu0 %v49_v2, %s998_s24 }
  0x10   :  { %105 = vrot.lane.b32.xlu1 %v50_v3, %s999_s0  ;;  %103 = vrot.lane.b32.xlu0 %v49_v2, %s999_s0 }
  0x14   :  { %155 = vrot.lane.b32.xlu1 %v50_v3, %s1000_s25  ;;  %153 = vrot.lane.b32.xlu0 %v49_v2, %s1000_s25 }
  0x18   :  { %205 = vrot.lane.b32.xlu1 %v50_v3, %s1001_s26  ;;  %203 = vrot.lane.b32.xlu0 %v49_v2, %s1001_s26 }
  0x1c   :  { %180 = vrot.lane.b32.xlu1 %v50_v3, %s1002_s27  ;;  %178 = vrot.lane.b32.xlu0 %v49_v2, %s1002_s27 }
  0x20   :  { %230 = vrot.lane.b32.xlu1 %v50_v3, %s1004_s28  ;;  %228 = vrot.lane.b32.xlu0 %v49_v2, %s1004_s28 }
  0x24   :  { %482 = vperm.xlu0 %921, %v24_v6  }
  0x76   :  { %v79_v10 = vpop.permute.xlu1 %78  ;;  %v129_v11 = vpop.permute.xlu0 %128 }
  0x7a   :  { %v81_v14 = vpop.permute.xlu1 %80  ;;  %v131_v16 = vpop.permute.xlu0 %130 }
  0x7b   :  { %v1094_v18 = vsel %vm82_vm0, %v79_v10, %v81_v14  ;;  %v84_v19 = vsel %vm82_vm0, %v81_v14, %v79_v10  ;;  %v133_v20 = vsel %vm132_vm1, %v129_v11, %v131_v16  ;;  %v134_v21 = vsel %vm132_vm1, %v131_v16, %v129_v11 }
  0x7c   :  { %v87_v22 = vcombine.low %v84_v19, %v1094_v18  ;;  %v88_v23 = vcombine.high %v84_v19, %v1094_v18  ;;  %v137_v24 = vcombine.low %v134_v21, %v133_v20  ;;  %v138_v25 = vcombine.high %v134_v21, %v133_v20 }
  0x7d   :  { %v800_v26 = vcombine.low %v133_v20, %v133_v20  ;;  %v801_v31 = vcombine.high %v133_v20, %v133_v20  ;;  %v796_v37 = vcombine.low %v1094_v18, %v1094_v18  ;;  %v797_v42 = vcombine.high %v1094_v18, %v1094_v18 }
  0x7e   :  { %v99_v29 = vsel %vm35_vm2, %v87_v22, 0.0  ;;  %v1117_v30 = vsel %vm35_vm2, %v88_v23, 0.0  ;;  %v56_v32 = vpop.permute.xlu1 %55  ;;  %v54_v33 = vpop.permute.xlu0 %53  ;;  %v149_v35 = vsel %vm1083_vm4, %v137_v24, 0.0  ;;  %v1127_v36 = vsel %vm1083_vm4, %v138_v25, 0.0 }
  0x7f   :  { %v257_v39 = vrot.slane %v99_v29, 4  ;;  %v58_v40 = vsel %vm57_vm3, %v54_v33, %v56_v32  ;;  %v59_v41 = vsel %vm57_vm3, %v56_v32, %v54_v33  ;;  %v259_v44 = vrot.slane %v1117_v30, 4 }
  0x80   :  { %v62_v45 = vcombine.low %v59_v41, %v58_v40  ;;  %v794_v46 = vcombine.low %v58_v40, %v58_v40  ;;  %v150_v47 = vsel %vm1109_vm10, %v800_v26, 0.0  ;;  %v269_v48 = vrot.slane %v149_v35, 4 }
  0x81   :  { %v271_v49 = vrot.slane %v1127_v36, 4  ;;  %v795_v52 = vcombine.high %v58_v40, %v58_v40  ;;  %v152_v53 = vsel %vm1109_vm10, %v801_v31, 0.0  ;;  %v63_v59 = vcombine.high %v59_v41, %v58_v40 }
  0x82   :  { %v106_v50 = vpop.permute.xlu1 %105  ;;  %v104_v51 = vpop.permute.xlu0 %103  ;;  %v75_v56 = vsel %vm1109_vm10, %v794_v46, 0.0  ;;  %v74_v58 = vsel %vm1145_vm11, %v62_v45, 0.0  ;;  %v270_v62 = vrot.slane %v150_v47, 4  ;;  %v272_v5 = vrot.slane %v152_v53, 4 }
  0x83   :  { %v108_v54 = vsel %vm107_vm5, %v104_v51, %v106_v50  ;;  %v109_v55 = vsel %vm107_vm5, %v106_v50, %v104_v51  ;;  %v307_v2 = vsel %vm305_vm7, %v75_v56, %v796_v37  ;;  %v77_v11 = vsel %vm1109_vm10, %v795_v52, 0.0 }
  0x84   :  { %v112_v60 = vcombine.low %v109_v55, %v108_v54  ;;  %v798_v61 = vcombine.low %v108_v54, %v108_v54  ;;  %v113_v63 = vcombine.high %v109_v55, %v108_v54  ;;  %v799_v3 = vcombine.high %v108_v54, %v108_v54 }
  0x85   :  { %v306_v13 = vsel %vm305_vm7, %v74_v58, %v257_v39  ;;  %v76_v29 = vsel %vm1145_vm11, %v63_v59, 0.0  ;;  %v309_v35 = vsel %vm305_vm7, %v77_v11, %v797_v42 }
  0x86   :  { %v156_v6 = vpop.permute.xlu1 %155  ;;  %v154_v7 = vpop.permute.xlu0 %153  ;;  %v125_v10 = vsel %vm1104_vm8, %v798_v61, 0.0  ;;  %v124_v12 = vsel %vm1166_vm13, %v112_v60, 0.0  ;;  %v127_v19 = vsel %vm1104_vm8, %v799_v3, 0.0  ;;  %v126_v37 = vsel %vm1166_vm13, %v113_v63, 0.0 }
  0x87   :  { %v158_v14 = vsel %vm1448_vm9, %v154_v7, %v156_v6  ;;  %v159_v16 = vsel %vm1448_vm9, %v156_v6, %v154_v7  ;;  %v311_v18 = vsel %vm305_vm7, %v125_v10, %v270_v62  ;;  %v313_v25 = vsel %vm305_vm7, %v127_v19, %v272_v5 }
  0x88   :  { %v162_v20 = vcombine.low %v158_v14, %v159_v16  ;;  %v163_v21 = vcombine.high %v158_v14, %v159_v16  ;;  %v802_v22 = vcombine.low %v159_v16, %v159_v16  ;;  %v803_v23 = vcombine.high %v159_v16, %v159_v16 }
  0x89   :  { %v846_v24 = vpack.c.bf16 %v311_v18, %v307_v2  ;;  %v310_v26 = vsel %vm305_vm7, %v124_v12, %v269_v48  ;;  %v854_v46 = vpack.c.bf16 %v313_v25, %v309_v35  ;;  %v308_v55 = vsel %vm305_vm7, %v76_v29, %v259_v44 }
  0x8a   :  { %v175_v31 = vsel %vm1104_vm8, %v802_v22, 0.0  ;;  %v177_v32 = vsel %vm1104_vm8, %v803_v23, 0.0  ;;  %v206_v33 = vpop.permute.xlu1 %205  ;;  %v204_v36 = vpop.permute.xlu0 %203  ;;  %v174_v39 = vsel %vm1088_vm6, %v162_v20, 0.0  ;;  %v176_v40 = vsel %vm1088_vm6, %v163_v21, 0.0 }
  0x8b   :  { %v286_v41 = vrot.slane %v175_v31, 4  ;;  %v288_v45 = vrot.slane %v177_v32, 4  ;;  %847 = vmatprep.subr.bf16.mxu0 %v846_v24  ;;  %v208_v47 = vsel %vm1449_vm12, %v204_v36, %v206_v33  ;;  %v209_v42 = vsel %vm1449_vm12, %v206_v33, %v204_v36  ;;  %855 = vmatprep.subr.bf16.mxu1 %v854_v46  ;;  %vm1229_vm12 = vmand %vm1451_vm14, %vm1109_vm10 }
  0x8c   :  { %v848_v48 = vpack.c.bf16 %v310_v26, %v306_v13  ;;  %v212_v50 = vcombine.low %v208_v47, %v209_v42  ;;  %v213_v51 = vcombine.high %v208_v47, %v209_v42  ;;  %v806_v52 = vcombine.low %v209_v42, %v209_v42 }
  0x8d   :  { %v807_v53 = vcombine.high %v209_v42, %v209_v42  ;;  %v285_v54 = vrot.slane %v174_v39, 4  ;;  %v312_v56 = vsel %vm305_vm7, %v126_v37, %v271_v49  ;;  %vm1450_vm9 = vcmp.lt.s32.totalorder %v1072_v8, 111 }
  0x8e   :  { %849 = vmatpush1.bf16.msra.mxu0 %v848_v48  ;;  %v181_v58 = vpop.permute.xlu1 %180  ;;  %v179_v59 = vpop.permute.xlu0 %178  ;;  %v287_v60 = vrot.slane %v176_v40, 4  ;;  %v225_v61 = vsel %vm1451_vm14, %v806_v52, 0.0  ;;  %v315_v63 = vsel %vm305_vm7, %v1121_v34, %v286_v41  ;;  %v297_v2 = vrot.slane %v212_v50, 4  ;;  %v22_v52 = vld [vmem:[%s1444_s1] sm:$0xff] }
  0x8f   :  { %v227_v62 = vsel %vm1451_vm14, %v807_v53, 0.0  ;;  %v856_v30 = vpack.c.bf16 %v312_v56, %v308_v55  ;;  %v183_v44 = vsel %vm182_vm15, %v179_v59, %v181_v58  ;;  %v317_v49 = vsel %vm305_vm7, %v1133_v38, %v288_v45 }
  0x90   :  { %v298_v3 = vrot.slane %v225_v61, 4  ;;  %v299_v5 = vrot.slane %v213_v51, 4  ;;  %v300_v6 = vrot.slane %v227_v62, 4  ;;  %v184_v7 = vsel %vm182_vm15, %v181_v58, %v179_v59 }
  0x91   :  { %857 = vmatpush1.bf16.msra.mxu1 %v856_v30  ;;  %v187_v10 = vcombine.low %v183_v44, %v184_v7  ;;  %v188_v11 = vcombine.high %v183_v44, %v184_v7  ;;  %v804_v12 = vcombine.low %v184_v7, %v184_v7  ;;  %v805_v13 = vcombine.high %v184_v7, %v184_v7 }
  0x92   :  { %v231_v14 = vpop.permute.xlu1 %230  ;;  %v229_v16 = vpop.permute.xlu0 %228  ;;  %v314_v21 = vsel %vm305_vm7, %v1040_v0, %v285_v54  ;;  %v316_v22 = vsel %vm305_vm7, %v1045_v1, %v287_v60 }
  0x93   :  { %v233_v19 = vsel %vm1450_vm9, %v229_v16, %v231_v14  ;;  %v234_v20 = vsel %vm1450_vm9, %v231_v14, %v229_v16  ;;  %v199_v23 = vsel %vm1083_vm4, %v187_v10, 0.0  ;;  %v201_v24 = vsel %vm1083_vm4, %v188_v11, 0.0  ;;  %vm1257_vm9 = vmand %vm1451_vm14, %vm1104_vm8 }
  0x94   :  { %v237_v25 = vcombine.low %v233_v19, %v234_v20  ;;  %v238_v26 = vcombine.high %v233_v19, %v234_v20  ;;  %v200_v29 = vsel %vm1229_vm12, %v804_v12, 0.0  ;;  %v202_v31 = vsel %vm1229_vm12, %v805_v13, 0.0 }
  0x95   :  { %v318_v32 = vsel %vm305_vm7, %v199_v23, %v297_v2  ;;  %v320_v33 = vsel %vm305_vm7, %v201_v24, %v299_v5  ;;  %v319_v35 = vsel %vm305_vm7, %v200_v29, %v298_v3  ;;  %v321_v36 = vsel %vm305_vm7, %v202_v31, %v300_v6  ;;  %v25_v3 = vld [vmem:[%s1445_s4] sm:$0xf] }
  0x96   :  { %v852_v37 = vpack.c.bf16 %v318_v32, %v314_v21  ;;  %v860_v39 = vpack.c.bf16 %v320_v33, %v316_v22  ;;  %v850_v41 = vpack.c.bf16 %v319_v35, %v315_v63  ;;  %v858_v45 = vpack.c.bf16 %v321_v36, %v317_v49 }
  0x97   :  { %v808_v46 = vcombine.low %v234_v20, %v234_v20  ;;  %v809_v47 = vcombine.high %v234_v20, %v234_v20  ;;  %v249_v50 = vsel %vm1088_vm6, %v237_v25, 0.0  ;;  %v251_v51 = vsel %vm1088_vm6, %v238_v26, 0.0 }
  0x98   :  { %851 = vmatprep.subr.bf16.mxu0 %v850_v41  ;;  %859 = vmatprep.subr.bf16.mxu1 %v858_v45  ;;  %vm322_vm14 = vcmask 293888  }
  0x99   :  { %v250_v42 = vsel %vm1257_vm9, %v808_v46, 0.0  ;;  %v252_v48 = vsel %vm1257_vm9, %v809_v47, 0.0  ;;  %853 = vmatpush1.bf16.msra.mxu0 %v852_v37  ;;  %861 = vmatpush1.bf16.msra.mxu1 %v860_v39 }
  0x9a   :  { %810 = vmatprep.subr.msk.mxu0 %vm305_vm7, %v250_v42  ;;  %813 = vmatprep.subr.msk.mxu1 %vm305_vm7, %v252_v48 }
  0x9d   :  { %811 = vmatpush1.msk.msra.mxu0 %vm305_vm7, %v249_v50  ;;  %814 = vmatpush1.msk.msra.mxu1 %vm305_vm7, %v251_v51  ;;  %vm1006_vm7 = vmmov 1  }
  0x9e   :  { %812 = vmatmul.mubr.msk.f32.vlgmr.msra.gmra.mrb[0].mxu0 %vm322_vm14, %v22_v52  ;;  %815 = vmatmul.mubr.msk.f32.vlgmr.msra.gmra.mrb[0].mxu1 %vm322_vm14, %v22_v52  ;;  %vm863_vm14 = vmpackc.low %vm1006_vm7, %vm1109_vm10 }
  0x9f   :  { %689 = vmatprep.mubr.f32.mxu0 %v1003_v4  ;;  %760 = vmatprep.mubr.f32.mxu1 %v1003_v4 }
  0xa3   :  { %v483_v53 = vpop.permute.xlu0 %482 }
 0x171   :  { %v398_v54 = vpop.f32.mrb[0].mxu0  ;;  %v475_v55 = vpop.f32.mrb[0].mxu1 }
 0x172   :  { %v485_v56 = vadd.f32 %v483_v53, %v398_v54  ;;  %v487_v58 = vadd.f32 %v483_v53, %v475_v55  ;;  %v400_v59 = vpop.f32.mrb[1].mxu0  ;;  %v477_v60 = vpop.f32.mrb[1].mxu1 }
 0x173   :  { %v486_v61 = vadd.f32 %v483_v53, %v400_v59  ;;  %v488_v62 = vadd.f32 %v483_v53, %v477_v60 }
 0x174   :  { %v1278_v63 = vmax.f32 %v485_v56, 0.0  ;;  %v1280_v2 = vmax.f32 %v487_v58, 0.0 }
 0x175   :  { %v1282_v30 = vmax.f32 %v486_v61, 0.0  ;;  %v1284_v44 = vmax.f32 %v488_v62, 0.0 }
 0x176   :  { %v927_v4 = vpack.i.bf16 %v1280_v2, %v1278_v63 }
 0x177   :  { %v957_v49 = vpack.i.bf16 %v1284_v44, %v1282_v30 }
 0x178   :  { %928 = vrot.lane.b32.xlu0 %v927_v4, %s996_s22  ;;  %923 = vrot.lane.b32.xlu1 %v927_v4, %s998_s24 }
 0x17c   :  { %933 = vrot.lane.b32.xlu0 %v927_v4, %s999_s0  ;;  %958 = vrot.lane.b32.xlu1 %v957_v49, %s998_s24 }
 0x180   :  { %938 = vrot.lane.b32.xlu0 %v927_v4, %s997_s23  ;;  %963 = vrot.lane.b32.xlu1 %v957_v49, %s996_s22 }
 0x184   :  { %943 = vrot.lane.b32.xlu0 %v927_v4, %s1000_s25  ;;  %968 = vrot.lane.b32.xlu1 %v957_v49, %s999_s0 }
 0x188   :  { %948 = vrot.lane.b32.xlu0 %v927_v4, %s1002_s27  ;;  %973 = vrot.lane.b32.xlu1 %v957_v49, %s997_s23 }
 0x18c   :  { %953 = vrot.lane.b32.xlu0 %v927_v4, %s1001_s26  ;;  %978 = vrot.lane.b32.xlu1 %v957_v49, %s1000_s25 }
 0x190   :  { %605 = vrot.lane.b32.xlu0 %v1278_v63, %s1004_s28  ;;  %983 = vrot.lane.b32.xlu1 %v957_v49, %s1002_s27 }
 0x194   :  { %609 = vrot.lane.b32.xlu0 %v1282_v30, %s1004_s28  ;;  %988 = vrot.lane.b32.xlu1 %v957_v49, %s1001_s26 }
 0x198   :  { %769 = vperm.xlu0 %921, %v25_v3   ;;  %607 = vrot.lane.b32.xlu1 %v1280_v2, %s1004_s28 }
 0x19c   :  { %611 = vrot.lane.b32.xlu1 %v1284_v44, %s1004_s28 }
 0x1ea   :  { %v929_v5 = vpop.permute.xlu0 %928  ;;  %v924_v6 = vpop.permute.xlu1 %923 }
 0x1eb   :  { %v926_v13 = vunpack.i.h.bf16 %v924_v6  ;;  %v925_v14 = vunpack.i.l.bf16 %v924_v6  ;;  %v931_v20 = vunpack.i.h.bf16 %v929_v5  ;;  %v930_v21 = vunpack.i.l.bf16 %v929_v5 }
 0x1ee   :  { %v934_v7 = vpop.permute.xlu0 %933  ;;  %v959_v10 = vpop.permute.xlu1 %958 }
 0x1ef   :  { %v961_v11 = vunpack.i.h.bf16 %v959_v10  ;;  %v960_v12 = vunpack.i.l.bf16 %v959_v10  ;;  %v936_v48 = vunpack.i.h.bf16 %v934_v7  ;;  %v935_v50 = vunpack.i.l.bf16 %v934_v7 }
 0x1f1   :  { %v501_v24 = vsel %vm57_vm3, %v925_v14, %v960_v12  ;;  %v502_v25 = vsel %vm57_vm3, %v926_v13, %v961_v11  ;;  %v503_v26 = vsel %vm57_vm3, %v960_v12, %v925_v14  ;;  %v504_v29 = vsel %vm57_vm3, %v961_v11, %v926_v13  ;;  %vm866_vm3 = vmpackc.low %vm35_vm2, %vm1145_vm11 }
 0x1f2   :  { %v939_v16 = vpop.permute.xlu0 %938  ;;  %v964_v19 = vpop.permute.xlu1 %963  ;;  %vm872_vm2 = vmpackc.low %vm1083_vm4, %vm1166_vm13 }
 0x1f3   :  { %v966_v22 = vunpack.i.h.bf16 %v964_v19  ;;  %v965_v23 = vunpack.i.l.bf16 %v964_v19  ;;  %v941_v53 = vunpack.i.h.bf16 %v939_v16  ;;  %v940_v54 = vunpack.i.l.bf16 %v939_v16 }
 0x1f5   :  { %v518_v31 = vsel %vm82_vm0, %v931_v20, %v966_v22  ;;  %v520_v32 = vsel %vm82_vm0, %v966_v22, %v931_v20  ;;  %v517_v33 = vsel %vm82_vm0, %v930_v21, %v965_v23  ;;  %v519_v35 = vsel %vm82_vm0, %v965_v23, %v930_v21  ;;  %vm869_vm0 = vmpackc.low %vm1109_vm10, %vm1104_vm8 }
 0x1f6   :  { %v862_v36 = vpack.c.bf16 %v517_v33, %v501_v24  ;;  %v865_v37 = vpack.c.bf16 %v519_v35, %v503_v26  ;;  %v886_v39 = vpack.c.bf16 %v518_v31, %v502_v25  ;;  %v889_v41 = vpack.c.bf16 %v520_v32, %v504_v29  ;;  %v944_v45 = vpop.permute.xlu0 %943  ;;  %v969_v46 = vpop.permute.xlu1 %968 }
 0x1f7   :  { %v971_v47 = vunpack.i.h.bf16 %v969_v46  ;;  %v970_v42 = vunpack.i.l.bf16 %v969_v46  ;;  %v946_v12 = vunpack.i.h.bf16 %v944_v45  ;;  %v945_v13 = vunpack.i.l.bf16 %v944_v45 }
 0x1f8   :  { %864 = vmatprep.subr.msk.bf16.mxu0 %vm863_vm14, %v862_v36  ;;  %888 = vmatprep.subr.msk.bf16.mxu1 %vm863_vm14, %v886_v39  ;;  %vm875_vm14 = vmpackc.low %vm1104_vm8, %vm1006_vm7  ;;  %vm1472_vm8 = vcmp.lt.s32.totalorder %v1072_v8, 112 }
 0x1f9   :  { %867 = vmatpush1.bf16.msk.msra.mxu0 %vm866_vm3, %v865_v37  ;;  %891 = vmatpush1.bf16.msk.msra.mxu1 %vm866_vm3, %v889_v41  ;;  %v534_v43 = vsel %vm107_vm5, %v936_v48, %v971_v47  ;;  %v536_v58 = vsel %vm107_vm5, %v971_v47, %v936_v48  ;;  %v533_v59 = vsel %vm107_vm5, %v935_v50, %v970_v42  ;;  %vm878_vm3 = vmpackc.low %vm1088_vm6, %vm1006_vm7 }
 0x1fa   :  { %v949_v51 = vpop.permute.xlu0 %948  ;;  %v974_v52 = vpop.permute.xlu1 %973  ;;  %v535_v60 = vsel %vm107_vm5, %v970_v42, %v935_v50  ;;  %vm1473_vm13 = vmmov %vm1472_vm8 }
 0x1fb   :  { %v976_v55 = vunpack.i.h.bf16 %v974_v52  ;;  %v975_v56 = vunpack.i.l.bf16 %v974_v52 }
 0x1fd   :  { %v550_v61 = vsel %vm132_vm1, %v941_v53, %v976_v55  ;;  %v552_v62 = vsel %vm132_vm1, %v976_v55, %v941_v53  ;;  %v549_v4 = vsel %vm132_vm1, %v940_v54, %v975_v56  ;;  %v551_v49 = vsel %vm132_vm1, %v975_v56, %v940_v54 }
 0x1fe   :  { %v868_v3 = vpack.c.bf16 %v549_v4, %v533_v59  ;;  %v871_v5 = vpack.c.bf16 %v551_v49, %v535_v60  ;;  %v892_v6 = vpack.c.bf16 %v550_v61, %v534_v43  ;;  %v895_v7 = vpack.c.bf16 %v552_v62, %v536_v58  ;;  %v954_v10 = vpop.permute.xlu0 %953  ;;  %v979_v11 = vpop.permute.xlu1 %978 }
 0x1ff   :  { %v981_v14 = vunpack.i.h.bf16 %v979_v11  ;;  %v980_v16 = vunpack.i.l.bf16 %v979_v11  ;;  %vm1468_vm1 = vcmp.lt.s32.totalorder %v1072_v8, 127  ;;  %v956_v31 = vunpack.i.h.bf16 %v954_v10 }
 0x200   :  { %870 = vmatprep.subr.msk.bf16.mxu0 %vm869_vm0, %v868_v3  ;;  %894 = vmatprep.subr.msk.bf16.mxu1 %vm869_vm0, %v892_v6  ;;  %vm1469_vm5 = vmmov %vm1468_vm1  ;;  %v955_v32 = vunpack.i.l.bf16 %v954_v10 }
 0x201   :  { %v566_v28 = vsel %vm1468_vm1, %v946_v12, %v981_v14  ;;  %v568_v19 = vsel %vm1469_vm5, %v981_v14, %v946_v12  ;;  %vm1470_vm10 = vmmov %vm1468_vm1  ;;  %873 = vmatpush1.bf16.msk.msra.mxu0 %vm872_vm2, %v871_v5  ;;  %897 = vmatpush1.bf16.msk.msra.mxu1 %vm872_vm2, %v895_v7 }
 0x202   :  { %v565_v20 = vsel %vm1470_vm10, %v945_v13, %v980_v16  ;;  %vm1471_vm11 = vmmov %vm1468_vm1  ;;  %v898_v22 = vpack.c.bf16 %v568_v19, %v1284_v44  ;;  %v901_v23 = vpack.c.bf16 %v566_v28, %v1280_v2  ;;  %v984_v26 = vpop.permute.xlu1 %983  ;;  %v606_v27 = vpop.permute.xlu0 %605  ;;  %v951_v2 = vunpack.i.h.bf16 %v949_v51 }
 0x203   :  { %v567_v21 = vsel %vm1471_vm11, %v980_v16, %v945_v13  ;;  %v877_v25 = vpack.c.bf16 %v565_v20, %v1278_v63  ;;  %v986_v29 = vunpack.i.h.bf16 %v984_v26  ;;  %v985_v44 = vunpack.i.l.bf16 %v984_v26  ;;  %vm1474_vm0 = vmmov %vm1472_vm8 }
 0x204   :  { %v874_v24 = vpack.c.bf16 %v567_v21, %v1282_v30  ;;  %900 = vmatprep.subr.msk.bf16.mxu1 %vm875_vm14, %v898_v22  ;;  %v950_v30 = vunpack.i.l.bf16 %v949_v51  ;;  %vm1475_vm2 = vmmov %vm1474_vm0  ;;  %vm1476_vm1 = vcmp.lt.s32.totalorder %v1075_v9, 240  ;;  %vm1477_vm10 = vcmp.lt.s32.totalorder %v1072_v8, 111 }
 0x205   :  { %903 = vmatpush1.bf16.msk.msra.mxu1 %vm878_vm3, %v901_v23  ;;  %v582_v35 = vsel %vm182_vm15, %v951_v2, %v986_v29  ;;  %v584_v36 = vsel %vm182_vm15, %v986_v29, %v951_v2  ;;  %vm881_vm5 = vmpackc.low %vm1476_vm1, %vm1229_vm12 }
 0x206   :  { %876 = vmatprep.subr.msk.bf16.mxu0 %vm875_vm14, %v874_v24  ;;  %v989_v63 = vpop.permute.xlu1 %988  ;;  %v581_v37 = vsel %vm182_vm15, %v950_v30, %v985_v44  ;;  %v583_v39 = vsel %vm182_vm15, %v985_v44, %v950_v30  ;;  %v610_v42 = vpop.permute.xlu0 %609  ;;  %vm884_vm15 = vmpackc.low %vm1006_vm7, %vm1083_vm4  ;;  %vm621_vm4 = vcmask 588800  }
 0x207   :  { %879 = vmatpush1.bf16.msk.msra.mxu0 %vm878_vm3, %v877_v25  ;;  %v991_v57 = vunpack.i.h.bf16 %v989_v63  ;;  %v990_v33 = vunpack.i.l.bf16 %v989_v63  ;;  %v615_v54 = vsel %vm1477_vm10, %v610_v42, %v606_v27  ;;  %vm1478_vm12 = vmmov %vm1477_vm10 }
 0x208   :  { %vm1479_vm11 = vmmov %vm1477_vm10 }
 0x209   :  { %v598_v41 = vsel %vm1472_vm8, %v956_v31, %v991_v57  ;;  %v600_v45 = vsel %vm1473_vm13, %v991_v57, %v956_v31  ;;  %v597_v46 = vsel %vm1474_vm0, %v955_v32, %v990_v33  ;;  %v599_v47 = vsel %vm1475_vm2, %v990_v33, %v955_v32  ;;  %vm1480_vm7 = vmmov %vm1477_vm10 }
 0x20a   :  { %v880_v48 = vpack.c.bf16 %v599_v47, %v583_v39  ;;  %v883_v50 = vpack.c.bf16 %v597_v46, %v581_v37  ;;  %v904_v51 = vpack.c.bf16 %v600_v45, %v584_v36  ;;  %v907_v52 = vpack.c.bf16 %v598_v41, %v582_v35  ;;  %v608_v53 = vpop.permute.xlu1 %607 }
 0x20b   :  { %v613_v56 = vsel %vm1480_vm7, %v606_v27, %v610_v42 }
 0x20c   :  { %882 = vmatprep.subr.msk.bf16.mxu0 %vm881_vm5, %v880_v48  ;;  %906 = vmatprep.subr.msk.bf16.mxu1 %vm881_vm5, %v904_v51 }
 0x20d   :  { %885 = vmatpush1.bf16.msk.msra.mxu0 %vm884_vm15, %v883_v50  ;;  %909 = vmatpush1.bf16.msk.msra.mxu1 %vm884_vm15, %v907_v52 }
 0x20e   :  { %v612_v18 = vpop.permute.xlu1 %611  ;;  %828 = vmatprep.subr.msk.mxu0 %vm1257_vm9, %v615_v54 }
 0x20f   :  { %v614_v9 = vsel %vm1478_vm12, %v608_v53, %v612_v18  ;;  %v616_v55 = vsel %vm1479_vm11, %v612_v18, %v608_v53 }
 0x210   :  { %843 = vmatprep.subr.msk.mxu1 %vm1257_vm9, %v616_v55 }
 0x211   :  { %829 = vmatpush1.msk.msra.mxu0 %vm1088_vm6, %v613_v56  ;;  %844 = vmatpush1.msk.msra.mxu1 %vm1088_vm6, %v614_v9 }
 0x212   :  { %830 = vmatmul.mubr.msk.f32.vlgmr.msra.gmra.mrb[2].mxu0 %vm621_vm4, %v23_v15  ;;  %845 = vmatmul.mubr.msk.f32.vlgmr.msra.gmra.mrb[2].mxu1 %vm621_vm4, %v23_v15 }
 0x217   :  { %v770_v43 = vpop.permute.xlu0 %769 }
 0x2e5   :  { %v691_v58 = vpop.f32.mrb[2].mxu0  ;;  %v762_v59 = vpop.f32.mrb[2].mxu1 }
 0x2e6   :  { %v772_v60 = vadd.f32 %v770_v43, %v691_v58  ;;  %v774_v61 = vadd.f32 %v770_v43, %v762_v59  ;;  %v693_v62 = vpop.f32.mrb[3].mxu0  ;;  %v764_v4 = vpop.f32.mrb[3].mxu1 }
 0x2e7   :  { %v773_v8 = vadd.f32 %v770_v43, %v693_v62  ;;  %v775_v49 = vadd.f32 %v770_v43, %v764_v4 }
 0x2e8   :  { %v776_v40 = vadd.f32 %v772_v60, %v1040_v0  ;;  %v778_v3 = vadd.f32 %v774_v61, %v1045_v1 }
 0x2e9   :  { %v777_v5 = vadd.f32 %v773_v8, %v1121_v34  ;;  %v779_v17 = vadd.f32 %v775_v49, %v1133_v38 }
 0x2eb   :  { %v784_v6 = vcombine.low %v776_v40, %v777_v5  ;;  %v785_v7 = vcombine.low %v778_v3, %v779_v17 }
 0x2ed   :  { %788 = vst [vmem:[%s1447_s5] sm:$0xff] %v784_v6  ;;  %789 = vst [vmem:[%s1447_s5 + $0x8] sm:$0xff] %v785_v7 }

</bundles_post_ra>
